<compile_context>
chip_gen: v7x
topology: tpu7x:2x2x1
jax: 0.10.0
libtpu: 0.0.40
codegen_flags: <defaults>
</compile_context>

<pallas_src>
import functools

import jax
import jax.numpy as jnp
from jax.experimental import pallas as pl
from jax.experimental.pallas import tpu as pltpu


def _nmse_kernel(pred_ref, lab_ref, fenzi_ref, fenmu_ref, *,
                 tiles_per_split, tile, total, needs_mask):
    """Accumulate per-sample partial sums for one feature tile.

    Grid is (n_splits, tiles_per_split); axis 1 walks feature tiles
    ("arbitrary"), axis 0 shards independent tile ranges across TensorCores
    ("parallel").  The two outputs are (B, 128) blocks that stay resident in
    VMEM across axis 1, i.e. they act as the accumulators (every lane of a
    block carries the same per-sample partial sum; the wrapper reads lane 0).
    """
    k = pl.program_id(1)

    @pl.when(k == 0)
    def _():
        fenzi_ref[...] = jnp.zeros_like(fenzi_ref)
        fenmu_ref[...] = jnp.zeros_like(fenmu_ref)

    pred = pred_ref[...].astype(jnp.float32)
    lab = lab_ref[...].astype(jnp.float32)
    err = pred - lab
    sq_err = err * err
    sq_lab = lab * lab

    if needs_mask:
        # Global tile index along the walked axis; zero out positions past the
        # true extent (the final block of the last split is a partial block and
        # its out-of-bounds contents are unspecified).
        t = pl.program_id(0) * tiles_per_split + k
        pos = t * tile + jax.lax.broadcasted_iota(jnp.int32, pred.shape, 1)
        valid = pos < total
        sq_err = jnp.where(valid, sq_err, 0.0)
        sq_lab = jnp.where(valid, sq_lab, 0.0)

    if pred.ndim == 3:  # dense (B, rows, 128) layout: fold the lane axis first
        sq_err = jnp.sum(sq_err, axis=2)
        sq_lab = jnp.sum(sq_lab, axis=2)

    # (B, 1) per-sample partials, broadcast-added across the 128 output lanes.
    fenzi_ref[...] += jnp.sum(sq_err, axis=1, keepdims=True)
    fenmu_ref[...] += jnp.sum(sq_lab, axis=1, keepdims=True)


@functools.partial(jax.jit, static_argnames=("block_bytes",))
def nmse_loss(predictions, labels, *, block_bytes=2 * 1024 * 1024):
    bsize = predictions.shape[0]
    # Row-major flatten == torch .view(bsize, -1); no dtype cast, no padding.
    pred2d = predictions.reshape(bsize, -1)
    lab2d = labels.reshape(bsize, -1)
    F = pred2d.shape[1]
    itemsize = jnp.dtype(predictions.dtype).itemsize

    # Feature elements per sample per tile, from the per-buffer byte budget.
    elems_budget = max(8 * 128, block_bytes // (bsize * itemsize))

    if F % 128 == 0:
        # Lane/sublane-dense 3-D layout (B, R, 128); grid walks the row axis.
        R = F // 128
        pred_in = pred2d.reshape(bsize, R, 128)
        lab_in = lab2d.reshape(bsize, R, 128)
        row_budget = max(8, ((elems_budget // 128) // 8) * 8)
        tile = R if R <= row_budget else row_budget
        total = R
        block = (bsize, tile, 128)
    else:
        # Fallback 2-D layout (B, F); grid walks the feature (lane) axis.
        pred_in, lab_in = pred2d, lab2d
        lane_budget = max(128, (elems_budget // 128) * 128)
        tile = F if F <= lane_budget else lane_budget
        total = F
        block = (bsize, tile)

    n_tiles = pl.cdiv(total, tile)
    # Shard the tile sequence over both TensorCores (v7x megacore) when it
    # splits evenly; harmless (a size-2 outer loop) on single-core chips.
    n_splits = 2 if (n_tiles >= 4 and n_tiles % 2 == 0) else 1
    tiles_per_split = n_tiles // n_splits
    needs_mask = (n_tiles * tile) != total

    if len(block) == 3:
        in_map = lambda s, k: (0, s * tiles_per_split + k, 0)
    else:
        in_map = lambda s, k: (0, s * tiles_per_split + k)
    out_map = lambda s, k: (0, s)

    kernel = functools.partial(
        _nmse_kernel, tiles_per_split=tiles_per_split, tile=tile,
        total=total, needs_mask=needs_mask)

    out_sds = jax.ShapeDtypeStruct((bsize, n_splits * 128), jnp.float32)
    fz, fm = pl.pallas_call(
        kernel,
        out_shape=(out_sds, out_sds),
        grid_spec=pltpu.PrefetchScalarGridSpec(
            num_scalar_prefetch=0,
            grid=(n_splits, tiles_per_split),
            in_specs=[pl.BlockSpec(block, in_map),
                      pl.BlockSpec(block, in_map)],
            out_specs=(pl.BlockSpec((bsize, 128), out_map),
                       pl.BlockSpec((bsize, 128), out_map)),
        ),
        compiler_params=pltpu.CompilerParams(
            dimension_semantics=("parallel", "arbitrary"),
            vmem_limit_bytes=32 * 1024 * 1024,
        ),
    )(pred_in, lab_in)

    # Combine per-split partials (all 128 lanes of a block are identical).
    fenzi = fz.reshape(bsize, n_splits, 128)[:, :, 0].sum(axis=1)
    fenmu = fm.reshape(bsize, n_splits, 128)[:, :, 0].sum(axis=1)
    return jnp.mean(fenzi / fenmu)


def _nmse_ref(predictions, labels):
    b = predictions.shape[0]
    p = predictions.reshape(b, -1).astype(jnp.float32)
    l = labels.reshape(b, -1).astype(jnp.float32)
    e = p - l
    return jnp.mean(jnp.sum(e * e, axis=1) / jnp.sum(l * l, axis=1))


if __name__ == "__main__":
    key = jax.random.PRNGKey(0)

    # (shape, dtype, block_bytes) — the first entry is the canonical module
    # input; the rest exercise the bf16, non-multiple-of-128, masked-tail and
    # two-core-split code paths on small arrays.
    cases = [
        ((2, 4, 16, 16), jnp.float32, 2 * 1024 * 1024),
        ((2, 4, 16, 16), jnp.bfloat16, 2 * 1024 * 1024),
        ((2, 3, 10, 10), jnp.float32, 2 * 1024 * 1024),
        ((2, 5, 8, 64), jnp.float32, 4096),    # 3 tiles, masked tail tile
        ((2, 4, 32, 32), jnp.float32, 4096),   # 4 tiles, 2-way parallel split
    ]
    for shape, dtype, bb in cases:
        key, kp, kl = jax.random.split(key, 3)
        preds = jax.random.normal(kp, shape, dtype=jnp.float32).astype(dtype)
        labs = jax.random.normal(kl, shape, dtype=jnp.float32).astype(dtype)
        out = jax.block_until_ready(nmse_loss(preds, labs, block_bytes=bb))
        ref = _nmse_ref(preds, labs)
        assert jnp.allclose(out, ref, rtol=2e-5, atol=1e-6), (shape, dtype, out, ref)
    print("KERNEL_OK")
</pallas_src>

<mosaic_0001>
module attributes {stable_mosaic.version = 11 : i64} {
  func.func @_nmse_kernel(%arg0: i32, %arg1: i32, %arg2: memref<2x8x128xf32, #tpu.memory_space<vmem>>, %arg3: memref<2x8x128xf32, #tpu.memory_space<vmem>>, %arg4: memref<2x128xf32, #tpu.memory_space<vmem>>, %arg5: memref<2x128xf32, #tpu.memory_space<vmem>>) attributes {dimension_semantics = [#tpu.dimension_semantics<parallel>, #tpu.dimension_semantics<arbitrary>], iteration_bounds = array<i64: 1, 1>, scalar_prefetch = 0 : i64, scratch_operands = 0 : i64, tpu.core_type = #tpu.core_type<tc>, window_params = [{transform_indices = @transform_0, window_bounds = array<i64: 2, 8, 128>}, {transform_indices = @transform_1, window_bounds = array<i64: 2, 8, 128>}, {transform_indices = @transform_2, window_bounds = array<i64: 2, 128>}, {transform_indices = @transform_3, window_bounds = array<i64: 2, 128>}]} {
    %c0_i32 = arith.constant 0 : i32
    %0 = arith.cmpi eq, %arg1, %c0_i32 : i32
    %1 = arith.extui %0 : i1 to i32
    %c0_i32_0 = arith.constant 0 : i32
    %2 = arith.cmpi ne, %1, %c0_i32_0 : i32
    scf.if %2 {
      %cst_17 = arith.constant 0.000000e+00 : f32
      %22 = vector.broadcast %cst_17 : f32 to vector<2x128xf32>
      %c0_18 = arith.constant 0 : index
      %c0_19 = arith.constant 0 : index
      %23 = vector.load %arg4[%c0_18, %c0_19] : memref<2x128xf32, #tpu.memory_space<vmem>>, vector<2x128xf32>
      tpu.vector_store %arg4[%c0_18, %c0_19], %22 {strides = array<i32>} : memref<2x128xf32, #tpu.memory_space<vmem>>, vector<2x128xf32>,
      %cst_20 = arith.constant 0.000000e+00 : f32
      %24 = vector.broadcast %cst_20 : f32 to vector<2x128xf32>
      %c0_21 = arith.constant 0 : index
      %c0_22 = arith.constant 0 : index
      %25 = vector.load %arg5[%c0_21, %c0_22] : memref<2x128xf32, #tpu.memory_space<vmem>>, vector<2x128xf32>
      tpu.vector_store %arg5[%c0_21, %c0_22], %24 {strides = array<i32>} : memref<2x128xf32, #tpu.memory_space<vmem>>, vector<2x128xf32>,
    } else {
    }
    %c0 = arith.constant 0 : index
    %c0_1 = arith.constant 0 : index
    %c0_2 = arith.constant 0 : index
    %3 = vector.load %arg2[%c0, %c0_1, %c0_2] : memref<2x8x128xf32, #tpu.memory_space<vmem>>, vector<2x8x128xf32>
    %c0_3 = arith.constant 0 : index
    %c0_4 = arith.constant 0 : index
    %c0_5 = arith.constant 0 : index
    %4 = vector.load %arg3[%c0_3, %c0_4, %c0_5] : memref<2x8x128xf32, #tpu.memory_space<vmem>>, vector<2x8x128xf32>
    %5 = arith.subf %3, %4 : vector<2x8x128xf32>
    %6 = arith.mulf %5, %5 : vector<2x8x128xf32>
    %7 = arith.mulf %4, %4 : vector<2x8x128xf32>
    %cst = arith.constant dense<0.000000e+00> : vector<2x8xf32>
    %8 = vector.multi_reduction <add>, %6, %cst [2] : vector<2x8x128xf32> to vector<2x8xf32>
    %cst_6 = arith.constant dense<0.000000e+00> : vector<2x8xf32>
    %9 = vector.multi_reduction <add>, %7, %cst_6 [2] : vector<2x8x128xf32> to vector<2x8xf32>
    %c0_7 = arith.constant 0 : index
    %c0_8 = arith.constant 0 : index
    %10 = vector.load %arg4[%c0_7, %c0_8] : memref<2x128xf32, #tpu.memory_space<vmem>>, vector<2x128xf32>
    %cst_9 = arith.constant dense<0.000000e+00> : vector<2xf32>
    %11 = vector.multi_reduction <add>, %8, %cst_9 [1] : vector<2x8xf32> to vector<2xf32>
    %12 = vector.shape_cast %11 : vector<2xf32> to vector<2x1xf32>
    %13 = vector.broadcast %12 : vector<2x1xf32> to vector<2x128xf32>
    %14 = arith.addf %10, %13 : vector<2x128xf32>
    %c0_10 = arith.constant 0 : index
    %c0_11 = arith.constant 0 : index
    %15 = vector.load %arg4[%c0_10, %c0_11] : memref<2x128xf32, #tpu.memory_space<vmem>>, vector<2x128xf32>
    tpu.vector_store %arg4[%c0_10, %c0_11], %14 {strides = array<i32>} : memref<2x128xf32, #tpu.memory_space<vmem>>, vector<2x128xf32>,
    %c0_12 = arith.constant 0 : index
    %c0_13 = arith.constant 0 : index
    %16 = vector.load %arg5[%c0_12, %c0_13] : memref<2x128xf32, #tpu.memory_space<vmem>>, vector<2x128xf32>
    %cst_14 = arith.constant dense<0.000000e+00> : vector<2xf32>
    %17 = vector.multi_reduction <add>, %9, %cst_14 [1] : vector<2x8xf32> to vector<2xf32>
    %18 = vector.shape_cast %17 : vector<2xf32> to vector<2x1xf32>
    %19 = vector.broadcast %18 : vector<2x1xf32> to vector<2x128xf32>
    %20 = arith.addf %16, %19 : vector<2x128xf32>
    %c0_15 = arith.constant 0 : index
    %c0_16 = arith.constant 0 : index
    %21 = vector.load %arg5[%c0_15, %c0_16] : memref<2x128xf32, #tpu.memory_space<vmem>>, vector<2x128xf32>
    tpu.vector_store %arg5[%c0_15, %c0_16], %20 {strides = array<i32>} : memref<2x128xf32, #tpu.memory_space<vmem>>, vector<2x128xf32>,
    return
  }
  func.func @transform_0(%arg0: i32, %arg1: i32) -> (i32, i32, i32) {
    %c1_i32 = arith.constant 1 : i32
    %0 = arith.muli %arg0, %c1_i32 : i32
    %1 = arith.addi %0, %arg1 : i32
    %c0_i32 = arith.constant 0 : i32
    %c0_i32_0 = arith.constant 0 : i32
    %c0_i32_1 = arith.constant 0 : i32
    return %c0_i32, %1, %c0_i32_0 : i32, i32, i32
  }
  func.func @transform_1(%arg0: i32, %arg1: i32) -> (i32, i32, i32) {
    %c1_i32 = arith.constant 1 : i32
    %0 = arith.muli %arg0, %c1_i32 : i32
    %1 = arith.addi %0, %arg1 : i32
    %c0_i32 = arith.constant 0 : i32
    %c0_i32_0 = arith.constant 0 : i32
    %c0_i32_1 = arith.constant 0 : i32
    return %c0_i32, %1, %c0_i32_0 : i32, i32, i32
  }
  func.func @transform_2(%arg0: i32, %arg1: i32) -> (i32, i32) {
    %c0_i32 = arith.constant 0 : i32
    %c0_i32_0 = arith.constant 0 : i32
    return %c0_i32, %arg0 : i32, i32
  }
  func.func @transform_3(%arg0: i32, %arg1: i32) -> (i32, i32) {
    %c0_i32 = arith.constant 0 : i32
    %c0_i32_0 = arith.constant 0 : i32
    return %c0_i32, %arg0 : i32, i32
  }
}

</mosaic_0001>

<bundles_post_ra>
// kernel: nmse_loss.1
= control target key start
LH: loop header
LB: loop body
LE: loop exit
PB: predicated region body
PF: predicated region fallthrough
CT: control target
= control target key end

     0   :  { %v132_v10 = vmov 0.0   ;;  %v74_v11 = vlaneseq  ;;  %vm84_vm0 = vcmask 1041409   ;;  %vm87_vm1 = vcmask 58368   ;;  %s183_s1 = inlined_call_operand.vmem [shape: f32[2,8,128], index: 1, kind: input, shape index: {}]   ;;  %s184_s0 = inlined_call_operand.vmem [shape: f32[2,8,128], index: 0, kind: input, shape index: {}]   ;;  %s185_s3 = inlined_call_operand.vmem [shape: f32[2,128], index: 3, kind: output, shape index: {1}]   ;;  %s186_s2 = inlined_call_operand.vmem [shape: f32[2,128], index: 2, kind: output, shape index: {0}]  }
   0x1   :  { %v55_v0 = vld [vmem:[%s183_s1] sm:$0xff]  ;;  %v56_v2 = vld [vmem:[%s183_s1 + $0x8] sm:$0xff]  ;;  %52 = vst [vmem:[%s185_s3] sm:$0x3] %v132_v10  ;;  %51 = vst [vmem:[%s186_s2] sm:$0x3] %v132_v10 }
   0x2   :  { %v53_v1 = vld [vmem:[%s184_s0] sm:$0xff]  ;;  %v61_v3 = vmul.f32 %v55_v0, %v55_v0  ;;  %v54_v5 = vld [vmem:[%s184_s0 + $0x8] sm:$0xff]  ;;  %v62_v8 = vmul.f32 %v56_v2, %v56_v2  ;;  %v75_v12 = vand.u32 127, %v74_v11  ;;  %v77_v13 = vshrl.u32 %v74_v11, 7 }
   0x3   :  { %v57_v4 = vsub.f32 %v53_v1, %v55_v0  ;;  %v58_v6 = vsub.f32 %v54_v5, %v56_v2 }
   0x4   :  { %67 = vadd.xlane.f32.xlu1 %v61_v3  ;;  %v78_v15 = vsub.s32 %v75_v12, %v77_v13 }
   0x5   :  { %v59_v7 = vmul.f32 %v57_v4, %v57_v4  ;;  %v60_v9 = vmul.f32 %v58_v6, %v58_v6 }
   0x7   :  { %63 = vadd.xlane.f32.xlu0 %v59_v7 }
   0x8   :  { %69 = vadd.xlane.f32.xlu1 %v62_v8  ;;  %v93_v27 = vld [vmem:[%s185_s3] sm:$0x3] }
   0x9   :  { %v71_v29 = vld [vmem:[%s186_s2] sm:$0x3] }
   0xb   :  { %65 = vadd.xlane.f32.xlu0 %v60_v9 }
  0x91   :  { %v68_v14 = vpop.xlane.xlu1 %67 }
  0x92   :  { %v99_v18 = vrot.slane %v68_v14, %v78_v15 }
  0x94   :  { %v64_v16 = vpop.xlane.xlu0 %63 }
  0x95   :  { %v70_v17 = vpop.xlane.xlu1 %69  ;;  %v79_v21 = vrot.slane %v64_v16, %v78_v15 }
  0x96   :  { %v103_v19 = vrot.slane %v70_v17, %v78_v15 }
  0x98   :  { %v66_v20 = vpop.xlane.xlu0 %65  ;;  %v104_v23 = vsel %vm84_vm0, %v103_v19, %v99_v18 }
  0x99   :  { %v83_v22 = vrot.slane %v66_v20, %v78_v15  ;;  %v106_v24 = vsel %vm87_vm1, %v104_v23, 0.0 }
  0x9a   :  { %107 = vadd.xlane.f32.xlu1 %v106_v24 }
  0x9b   :  { %v85_v25 = vsel %vm84_vm0, %v83_v22, %v79_v21 }
  0x9c   :  { %v88_v26 = vsel %vm87_vm1, %v85_v25, 0.0 }
  0x9d   :  { %89 = vadd.xlane.f32.xlu0 %v88_v26 }
 0x127   :  { %v108_v28 = vpop.xlane.xlu1 %107 }
 0x128   :  { %v109_v30 = vadd.f32 %v108_v28, %v93_v27 }
 0x12a   :  { %v90_v31 = vpop.xlane.xlu0 %89  ;;  %110 = vst [vmem:[%s185_s3] sm:$0x3] %v109_v30 }
 0x12b   :  { %v91_v32 = vadd.f32 %v90_v31, %v71_v29 }
 0x12d   :  { %92 = vst [vmem:[%s186_s2] sm:$0x3] %v91_v32 }

</bundles_post_ra>
